<compile_context>
chip_gen: v6e
topology: v6e:2x2x1
jax: 0.10.0
libtpu: 0.0.40
codegen_flags: <defaults>
</compile_context>

<pallas_src>
import jax
import jax.numpy as jnp
from jax.experimental import pallas as pl
from jax.experimental.pallas import tpu as pltpu

_LANES = 512            # lane-dense width (multiple of 128)
_MAX_BLOCK_ROWS = 1024  # 1024 x 512 f32 = 2 MiB per input per pipeline buffer


def _dice_partial_kernel(o_ref, m_ref, inter_ref, den1_ref, den2_ref):
    # o_ref / m_ref: (block_rows, LANES) tiles of the flattened inputs.
    p = o_ref[...].astype(jnp.float32)
    m = m_ref[...].astype(jnp.float32)

    # Sublane reductions only (cross-vreg VPU adds + one tiny XLU fold per
    # lane-tile); the final cross-lane reduce + divide are done in the wrapper.
    inter_ref[0] = jnp.sum(p * m, axis=0, keepdims=True)   # (1, LANES)
    den1_ref[0] = jnp.sum(p * p, axis=0, keepdims=True)    # (1, LANES)
    den2_ref[0] = jnp.sum(m * m, axis=0, keepdims=True)    # (1, LANES)


def dice_loss_lv(output, mask):
    """DICE loss matching PyTorch DICELoss_LV.forward (global reduction)."""
    o = output.reshape(-1)
    m = mask.reshape(-1)
    total = o.shape[0]

    lanes = _LANES
    rows = -(-total // lanes)                         # ceil(total / lanes)
    if rows <= _MAX_BLOCK_ROWS:
        block_rows = rows                             # full-extent block
        rows_padded = rows
    else:
        block_rows = _MAX_BLOCK_ROWS
        rows_padded = -(-rows // block_rows) * block_rows

    padded_total = rows_padded * lanes
    if padded_total != total:
        # Zero padding contributes 0 to all three sums -> semantics preserved.
        o = jnp.pad(o, (0, padded_total - total))
        m = jnp.pad(m, (0, padded_total - total))

    o2 = o.reshape(rows_padded, lanes)
    m2 = m.reshape(rows_padded, lanes)
    num_blocks = rows_padded // block_rows

    part_shape = jax.ShapeDtypeStruct((num_blocks, 1, lanes), jnp.float32)

    inter_p, den1_p, den2_p = pl.pallas_call(
        _dice_partial_kernel,
        out_shape=(part_shape, part_shape, part_shape),
        grid_spec=pltpu.PrefetchScalarGridSpec(
            num_scalar_prefetch=0,
            grid=(num_blocks,),
            in_specs=[
                pl.BlockSpec((block_rows, lanes), lambda i: (i, 0)),
                pl.BlockSpec((block_rows, lanes), lambda i: (i, 0)),
            ],
            out_specs=[
                pl.BlockSpec((1, 1, lanes), lambda i: (i, 0, 0)),
                pl.BlockSpec((1, 1, lanes), lambda i: (i, 0, 0)),
                pl.BlockSpec((1, 1, lanes), lambda i: (i, 0, 0)),
            ],
        ),
        compiler_params=pltpu.CompilerParams(
            dimension_semantics=("parallel",),
        ),
    )(o2, m2)

    # Tiny epilogue (a few KiB): final cross-lane/cross-block reduce + divide.
    intersection = jnp.sum(inter_p)
    den1 = jnp.sum(den1_p)
    den2 = jnp.sum(den2_p)
    eps = jnp.float32(1e-08)
    dice = 2.0 * ((intersection + eps) / (den1 + den2 + eps))
    return (1.0 - dice).astype(jnp.float32)


def _dice_loss_lv_ref(output, mask):
    o = output.astype(jnp.float32)
    m = mask.astype(jnp.float32)
    intersection = jnp.sum(o * m)
    den1 = jnp.sum(o * o)
    den2 = jnp.sum(m * m)
    eps = 1e-08
    dice = 2.0 * ((intersection + eps) / (den1 + den2 + eps))
    return 1.0 - dice


if __name__ == "__main__":
    key = jax.random.PRNGKey(0)
    k1, k2 = jax.random.split(key)
    N, C, H, W = 2, 1, 16, 16
    output = jax.nn.sigmoid(jax.random.normal(k1, (N, C, H, W), jnp.float32))
    mask = (jax.random.uniform(k2, (N, C, H, W)) > 0.5).astype(jnp.float32)

    loss = jax.block_until_ready(dice_loss_lv(output, mask))
    ref = jax.block_until_ready(_dice_loss_lv_ref(output, mask))

    assert jnp.allclose(loss, ref, atol=1e-5, rtol=1e-5), (loss, ref)
    print("KERNEL_OK")
</pallas_src>

<mosaic_0001>
module attributes {stable_mosaic.version = 11 : i64} {
  func.func @_dice_partial_kernel(%arg0: i32, %arg1: memref<1x512xf32, #tpu.memory_space<vmem>>, %arg2: memref<1x512xf32, #tpu.memory_space<vmem>>, %arg3: memref<1x1x512xf32, #tpu.memory_space<vmem>>, %arg4: memref<1x1x512xf32, #tpu.memory_space<vmem>>, %arg5: memref<1x1x512xf32, #tpu.memory_space<vmem>>) attributes {dimension_semantics = [#tpu.dimension_semantics<parallel>], iteration_bounds = array<i64: 1>, scalar_prefetch = 0 : i64, scratch_operands = 0 : i64, tpu.core_type = #tpu.core_type<tc>, window_params = [{transform_indices = @transform_0, window_bounds = array<i64: 1, 512>}, {transform_indices = @transform_1, window_bounds = array<i64: 1, 512>}, {transform_indices = @transform_2, window_bounds = array<i64: 1, 1, 512>}, {transform_indices = @transform_3, window_bounds = array<i64: 1, 1, 512>}, {transform_indices = @transform_4, window_bounds = array<i64: 1, 1, 512>}]} {
    %c0 = arith.constant 0 : index
    %c0_0 = arith.constant 0 : index
    %0 = vector.load %arg1[%c0, %c0_0] : memref<1x512xf32, #tpu.memory_space<vmem>>, vector<1x512xf32>
    %c0_1 = arith.constant 0 : index
    %c0_2 = arith.constant 0 : index
    %1 = vector.load %arg2[%c0_1, %c0_2] : memref<1x512xf32, #tpu.memory_space<vmem>>, vector<1x512xf32>
    %2 = arith.mulf %0, %1 : vector<1x512xf32>
    %cst = arith.constant dense<0.000000e+00> : vector<512xf32>
    %3 = vector.multi_reduction <add>, %2, %cst [0] : vector<1x512xf32> to vector<512xf32>
    %4 = vector.shape_cast %3 : vector<512xf32> to vector<1x512xf32>
    %c0_3 = arith.constant 0 : index
    %c0_4 = arith.constant 0 : index
    %c0_5 = arith.constant 0 : index
    %5 = vector.load %arg3[%c0_3, %c0_4, %c0_5] : memref<1x1x512xf32, #tpu.memory_space<vmem>>, vector<1x1x512xf32>
    %6 = vector.shape_cast %5 : vector<1x1x512xf32> to vector<1x512xf32>
    %7 = vector.shape_cast %4 : vector<1x512xf32> to vector<1x1x512xf32>
    tpu.vector_store %arg3[%c0_3, %c0_4, %c0_5], %7 {strides = array<i32>} : memref<1x1x512xf32, #tpu.memory_space<vmem>>, vector<1x1x512xf32>,
    %8 = arith.mulf %0, %0 : vector<1x512xf32>
    %cst_6 = arith.constant dense<0.000000e+00> : vector<512xf32>
    %9 = vector.multi_reduction <add>, %8, %cst_6 [0] : vector<1x512xf32> to vector<512xf32>
    %10 = vector.shape_cast %9 : vector<512xf32> to vector<1x512xf32>
    %c0_7 = arith.constant 0 : index
    %c0_8 = arith.constant 0 : index
    %c0_9 = arith.constant 0 : index
    %11 = vector.load %arg4[%c0_7, %c0_8, %c0_9] : memref<1x1x512xf32, #tpu.memory_space<vmem>>, vector<1x1x512xf32>
    %12 = vector.shape_cast %11 : vector<1x1x512xf32> to vector<1x512xf32>
    %13 = vector.shape_cast %10 : vector<1x512xf32> to vector<1x1x512xf32>
    tpu.vector_store %arg4[%c0_7, %c0_8, %c0_9], %13 {strides = array<i32>} : memref<1x1x512xf32, #tpu.memory_space<vmem>>, vector<1x1x512xf32>,
    %14 = arith.mulf %1, %1 : vector<1x512xf32>
    %cst_10 = arith.constant dense<0.000000e+00> : vector<512xf32>
    %15 = vector.multi_reduction <add>, %14, %cst_10 [0] : vector<1x512xf32> to vector<512xf32>
    %16 = vector.shape_cast %15 : vector<512xf32> to vector<1x512xf32>
    %c0_11 = arith.constant 0 : index
    %c0_12 = arith.constant 0 : index
    %c0_13 = arith.constant 0 : index
    %17 = vector.load %arg5[%c0_11, %c0_12, %c0_13] : memref<1x1x512xf32, #tpu.memory_space<vmem>>, vector<1x1x512xf32>
    %18 = vector.shape_cast %17 : vector<1x1x512xf32> to vector<1x512xf32>
    %19 = vector.shape_cast %16 : vector<1x512xf32> to vector<1x1x512xf32>
    tpu.vector_store %arg5[%c0_11, %c0_12, %c0_13], %19 {strides = array<i32>} : memref<1x1x512xf32, #tpu.memory_space<vmem>>, vector<1x1x512xf32>,
    return
  }
  func.func @transform_0(%arg0: i32) -> (i32, i32) {
    %c0_i32 = arith.constant 0 : i32
    %c0_i32_0 = arith.constant 0 : i32
    return %arg0, %c0_i32 : i32, i32
  }
  func.func @transform_1(%arg0: i32) -> (i32, i32) {
    %c0_i32 = arith.constant 0 : i32
    %c0_i32_0 = arith.constant 0 : i32
    return %arg0, %c0_i32 : i32, i32
  }
  func.func @transform_2(%arg0: i32) -> (i32, i32, i32) {
    %c0_i32 = arith.constant 0 : i32
    %c0_i32_0 = arith.constant 0 : i32
    %c0_i32_1 = arith.constant 0 : i32
    return %arg0, %c0_i32, %c0_i32_0 : i32, i32, i32
  }
  func.func @transform_3(%arg0: i32) -> (i32, i32, i32) {
    %c0_i32 = arith.constant 0 : i32
    %c0_i32_0 = arith.constant 0 : i32
    %c0_i32_1 = arith.constant 0 : i32
    return %arg0, %c0_i32, %c0_i32_0 : i32, i32, i32
  }
  func.func @transform_4(%arg0: i32) -> (i32, i32, i32) {
    %c0_i32 = arith.constant 0 : i32
    %c0_i32_0 = arith.constant 0 : i32
    %c0_i32_1 = arith.constant 0 : i32
    return %arg0, %c0_i32, %c0_i32_0 : i32, i32, i32
  }
}

</mosaic_0001>

<bundles_post_ra>
// kernel: tpu_custom_call.1
= control target key start
LH: loop header
LB: loop body
LE: loop exit
PB: predicated region body
PF: predicated region fallthrough
CT: control target
= control target key end

     0   :  { %10 = vsyncpa [#allocation3], 0  ;;  %s256_s0 = inlined_call_operand.hbm [shape: f32[1,512], index: 0, kind: input, shape index: {}]   ;;  %s257_s1 = inlined_call_operand.hbm [shape: f32[1,512], index: 1, kind: input, shape index: {}]   ;;  %s258_s2 = inlined_call_operand.hbm [shape: f32[1,1,512], index: 2, kind: output, shape index: {0}]   ;;  %s259_s3 = inlined_call_operand.hbm [shape: f32[1,1,512], index: 3, kind: output, shape index: {1}]   ;;  %s260_s4 = inlined_call_operand.hbm [shape: f32[1,1,512], index: 4, kind: output, shape index: {2}]  }
   0x1   :  { %11 = vsyncpa [#allocation6], 0 }
   0x2   :  { %12 = vsyncpa [#allocation4], 0 }
   0x3   :  { %13 = vsyncpa [#allocation9], 0  ;;  %s211_s15 = smov [#allocation2]   ;;  %s212_s17 = smov [#allocation5]  }
   0x4   :  { %s20_s16 = sshll.u32 %s211_s15, 4  ;;  %s30_s18 = sshll.u32 %s212_s17, 4  ;;  %s21_s16 = int_to_ptr.vmem [resolvable:$true] %s20_s16  ;;  %s31_s18 = int_to_ptr.vmem [resolvable:$true] %s30_s18 }
   0x5   :  { %s111_s19 = scalar_lea.vmem %s21_s16, 64  ;;  %p116_p1 = scmp.lt.s32.totalorder %s21_s16, %s21_s16 }
   0x6   :  { %p112_p0 = scmp.ne.s32.totalorder %s21_s16, %s111_s19  ;;  %p117_p2 = scmp.lt.s32.totalorder %s111_s19, %s111_s19 }
   0x8   :  { %p118_p3 = por %p117_p2, %p116_p1 }
   0xa   :  { %p119_p4 = pnand %p118_p3, %p112_p0 }
   0xc   :  { %122 = shalt.err (!%p119_p4)
}
   0xd   :  { %23 = dma.hbm_to_vmem [thread:$0]  %s256_s0, 64, %s21_s16, [#allocation3]  }
   0xe   :  { %s131_s22 = scalar_lea.vmem %s31_s18, 64  ;;  %p136_p6 = scmp.lt.s32.totalorder %s31_s18, %s31_s18 }
   0xf   :  { %p132_p5 = scmp.ne.s32.totalorder %s31_s18, %s131_s22  ;;  %p137_p7 = scmp.lt.s32.totalorder %s131_s22, %s131_s22 }
  0x11   :  { %p138_p8 = por %p137_p7, %p136_p6 }
  0x13   :  { %p139_p9 = pnand %p138_p8, %p132_p5 }
  0x15   :  { %142 = shalt.err (!%p139_p9)
}
  0x16   :  { %33 = dma.hbm_to_vmem [thread:$0]  %s257_s1, 64, %s31_s18, [#allocation6]  }
  0x17   :  { %203 = dma.done.wait [#allocation3], 64  }
  0x18   :  { %204 = vsyncadd [#allocation3], 4294967232 }
  0x19   :  { %205 = dma.done.wait [#allocation6], 64  }
  0x1a   :  { %206 = vsyncadd [#allocation6], 4294967232  ;;  %v44_v0 = vlaneseq  ;;  %s213_s25 = smov [#allocation8]   ;;  %s214_s27 = smov [#allocation7]   ;;  %v40_v1 = vld [vmem:[#allocation2] sm:$0xf] }
  0x1b   :  { %s71_s26 = sshll.u32 %s213_s25, 4  ;;  %s61_s0 = sshll.u32 %s214_s27, 4  ;;  %v41_v2 = vld [vmem:[#allocation5] sm:$0xf]  ;;  %v49_v3 = vmul.f32 %v40_v1, %v40_v1  ;;  %s72_s26 = int_to_ptr.vmem [resolvable:$true] %s71_s26  ;;  %s62_s0 = int_to_ptr.vmem [resolvable:$true] %s61_s0 }
  0x1c   :  { %vm46_vm0 = vcmp.lt.s32.totalorder %v44_v0, 512  ;;  %s215_s28 = smov [#allocation10]   ;;  %v42_v4 = vmul.f32 %v41_v2, %v40_v1  ;;  %v52_v5 = vmul.f32 %v41_v2, %v41_v2  ;;  %s143_s1 = scalar_lea.vmem %s72_s26, 64 }
  0x1d   :  { %s81_s29 = sshll.u32 %s215_s28, 4  ;;  %51 = vst.msk [vmem:[#allocation8] sm:$0xf] %vm46_vm0, %v49_v3  ;;  %p144_p10 = scmp.ne.s32.totalorder %s72_s26, %s143_s1  ;;  %s82_s29 = int_to_ptr.vmem [resolvable:$true] %s81_s29 }
  0x1e   :  { %48 = vst.msk [vmem:[#allocation7] sm:$0xf] %vm46_vm0, %v42_v4  ;;  %54 = vst.msk [vmem:[#allocation10] sm:$0xf] %vm46_vm0, %v52_v5  ;;  %p148_p11 = scmp.lt.s32.totalorder %s72_s26, %s72_s26  ;;  %p149_p12 = scmp.lt.s32.totalorder %s143_s1, %s143_s1 }
  0x20   :  { %p150_p13 = por %p149_p12, %p148_p11 }
  0x22   :  { %p151_p0 = pnand %p150_p13, %p144_p10 }
  0x24   :  { %154 = shalt.err (!%p151_p0)
}
  0x25   :  { %74 = dma.vmem_to_hbm [thread:$0]  %s72_s26, 64, %s259_s3, [#allocation9]  }
  0x26   :  { %s163_s6 = scalar_lea.vmem %s62_s0, 64  ;;  %p168_p2 = scmp.lt.s32.totalorder %s62_s0, %s62_s0 }
  0x27   :  { %p164_p1 = scmp.ne.s32.totalorder %s62_s0, %s163_s6  ;;  %p169_p3 = scmp.lt.s32.totalorder %s163_s6, %s163_s6 }
  0x29   :  { %p170_p4 = por %p169_p3, %p168_p2 }
  0x2b   :  { %p171_p5 = pnand %p170_p4, %p164_p1 }
  0x2d   :  { %174 = shalt.err (!%p171_p5)
}
  0x2e   :  { %64 = dma.vmem_to_hbm [thread:$0]  %s62_s0, 64, %s258_s2, [#allocation4]  }
  0x2f   :  { %s183_s9 = scalar_lea.vmem %s82_s29, 64  ;;  %p188_p7 = scmp.lt.s32.totalorder %s82_s29, %s82_s29 }
  0x30   :  { %p184_p6 = scmp.ne.s32.totalorder %s82_s29, %s183_s9  ;;  %p189_p8 = scmp.lt.s32.totalorder %s183_s9, %s183_s9 }
  0x32   :  { %p190_p9 = por %p189_p8, %p188_p7 }
  0x34   :  { %p191_p10 = pnand %p190_p9, %p184_p6 }
  0x36   :  { %194 = shalt.err (!%p191_p10)
}
  0x37   :  { %84 = dma.vmem_to_hbm [thread:$0]  %s82_s29, 64, %s260_s4, [#allocation9]  }
  0x38   :  { %207 = dma.done.wait [#allocation4], 64  }
  0x39   :  { %208 = vsyncadd [#allocation4], 4294967232 }
  0x3a   :  { %209 = dma.done.wait [#allocation9], 128  }
  0x3b   :  { %210 = vsyncadd [#allocation9], 4294967168 }
  0x3c   :  { %94 = vsyncpa [#allocation3], 1 }
  0x3d   :  { %95 = vsyncpa [#allocation6], 1 }
  0x3e   :  { %96 = vsyncpa [#allocation4], 1 }
  0x3f   :  { %97 = vsyncpa [#allocation9], 1 }

</bundles_post_ra>
